<compile_context>
chip_gen: v5e
topology: v5e:2x2
jax: 0.10.0
libtpu: 0.0.40
codegen_flags: <defaults>
</compile_context>

<pallas_src>
import functools

import numpy as np

import jax
import jax.numpy as jnp
from jax.experimental import pallas as pl
from jax.experimental.pallas import tpu as pltpu

# ---- module hyper-parameters (data-size ones shrunk for a fast self-test) ----
VOCAB_SIZE = 128          # original 12262 (only the gather-table size)
EMBEDDING_SIZE = 5        # as in module
FILTER_SIZES = (2, 3, 4)  # as in module
NUM_FILTERS = 50          # as in module
NUM_CLASS = 5             # as in module
SEQ_LEN = 16              # original 50 (shrunk for a small, fast example)
BATCH = 16                # original 100; pick >8 so the grid has >=2 blocks

E_PAD = 8                 # embedding dim zero-padded to the f32/bf16 sublane tile
BB = 8                    # batch rows per grid block (one sublane tile)


def textcnn_kernel(win_ref, wconv_ref, bconv_ref, mask_ref, wfc_ref, bfc_ref,
                   out_ref):
    """Everything after the embedding gather, for one batch block.

    win_ref   : (1, T_max*bb, kmax*E_PAD) bf16 im2col window matrix, rows are
                time-major within the block (row t*bb + b)
    wconv_ref : (kmax*E_PAD, 3*NF) bf16 fused conv weights (taps stacked along
                K, filter-size groups stacked along N, zero-padded taps/rows)
    bconv_ref : (1, 3*NF) f32 fused conv biases
    mask_ref  : (n_tail, 1, 3*NF) f32 additive -1e30 mask for the tail window
                positions that are out of range for the larger filter sizes
    wfc_ref   : (3*NF, C) bf16 final linear weight (transposed)
    bfc_ref   : (1, C) f32 final Bias parameter
    out_ref   : (1, bb, C) f32
    """
    bb = out_ref.shape[1]                       # batch rows in this block
    t_max = win_ref.shape[1] // bb              # window positions (time)
    n_tail = mask_ref.shape[0]                  # tail positions needing a mask
    tail_start = t_max - n_tail

    # One fused im2col conv for ALL filter sizes (N-fused to 3*NF lanes) and
    # ALL (t, b) window positions: a single bf16 MXU matmul.
    conv = jnp.dot(win_ref[0], wconv_ref[...],
                   preferred_element_type=jnp.float32)     # (t_max*bb, 3*NF)

    # Max-pool over time as a log2(T) tree over sublane-aligned value slices.
    # Only the last n_tail positions (invalid for the larger filter sizes) get
    # the -1e30 mask added before participating in the max.
    def leaf(t):
        v = conv[t * bb:(t + 1) * bb, :]
        if t >= tail_start:
            v = v + mask_ref[t - tail_start]                # (1, 3*NF) bcast
        return v

    def tree_max(lo, hi):
        if hi - lo == 1:
            return leaf(lo)
        mid = (lo + hi) // 2
        return jnp.maximum(tree_max(lo, mid), tree_max(mid, hi))

    pooled = tree_max(0, t_max)                             # (bb, 3*NF)

    # Per-channel conv bias and relu both commute with the max -> apply once.
    pooled = jnp.maximum(pooled + bconv_ref[...], 0.0)

    # Final linear over all three groups at once, plus the Bias parameter.
    out_ref[0] = (jnp.dot(pooled.astype(jnp.bfloat16), wfc_ref[...],
                          preferred_element_type=jnp.float32)
                  + bfc_ref[...])


def init_params(key):
    """PyTorch-layout parameters (same shapes as the nn.Module)."""
    n_fs = len(FILTER_SIZES)
    ks = jax.random.split(key, 2 + 2 * n_fs)
    params = {}
    params["embedding"] = 0.1 * jax.random.normal(
        ks[0], (VOCAB_SIZE, EMBEDDING_SIZE), jnp.float32)
    params["fc_w"] = 0.1 * jax.random.normal(
        ks[1], (NUM_CLASS, NUM_FILTERS * n_fs), jnp.float32)
    params["fc_b"] = jnp.ones((NUM_CLASS,), jnp.float32)   # torch.ones init
    for i, fs in enumerate(FILTER_SIZES):
        params[f"conv_w_{i}"] = 0.3 * jax.random.normal(
            ks[2 + 2 * i], (NUM_FILTERS, 1, fs, EMBEDDING_SIZE), jnp.float32)
        params[f"conv_b_{i}"] = 0.1 * jax.random.normal(
            ks[3 + 2 * i], (NUM_FILTERS,), jnp.float32)
    return params


def pack_params(params):
    """One-time packing into kernel-ready (padded, fused, bf16) layouts."""
    E, NF = EMBEDDING_SIZE, NUM_FILTERS
    n_fs, kmax = len(FILTER_SIZES), max(FILTER_SIZES)
    ke, nf_tot = kmax * E_PAD, n_fs * NF

    # Embedding table padded to E_PAD lanes and cast to bf16 once.
    emb = jnp.zeros((VOCAB_SIZE, E_PAD), jnp.bfloat16)
    emb = emb.at[:, :E].set(params["embedding"].astype(jnp.bfloat16))

    # Conv weights: taps stacked along K (kmax*E_PAD rows), filter-size groups
    # stacked along N (3*NF lanes); unused taps / embedding rows stay zero.
    wconv = jnp.zeros((ke, nf_tot), jnp.float32)
    bconv = jnp.zeros((1, nf_tot), jnp.float32)
    for i, fs in enumerate(FILTER_SIZES):
        w_t = jnp.transpose(params[f"conv_w_{i}"][:, 0], (1, 2, 0))  # (fs,E,NF)
        for k in range(fs):
            wconv = wconv.at[k * E_PAD:k * E_PAD + E,
                             i * NF:(i + 1) * NF].set(w_t[k])
        bconv = bconv.at[0, i * NF:(i + 1) * NF].set(params[f"conv_b_{i}"])

    return {
        "emb": emb,
        "wconv": wconv.astype(jnp.bfloat16),
        "bconv": bconv,
        "wfc": params["fc_w"].T.astype(jnp.bfloat16),       # (3*NF, C)
        "bfc": params["fc_b"][None, :],                      # (1, C)
    }


@jax.jit
def textcnn_forward(tokens, packed):
    B, S = tokens.shape
    NF, C = NUM_FILTERS, NUM_CLASS
    n_fs, kmax = len(FILTER_SIZES), max(FILTER_SIZES)
    ke, nf_tot = kmax * E_PAD, n_fs * NF
    t_max = S - min(FILTER_SIZES) + 1
    n_tail = kmax - min(FILTER_SIZES)

    bb = BB
    nb = -(-B // bb)
    b_pad = nb * bb

    # --- glue (plain JAX): time-major bf16 gather + im2col window matrix ---
    tokens_p = jnp.pad(tokens, ((0, b_pad - B), (0, 0)))          # pad batch
    emb_tm = packed["emb"][tokens_p.T]                            # (S,b_pad,E_PAD)
    emb_ext = jnp.concatenate(
        [emb_tm, jnp.zeros((kmax - 1, b_pad, E_PAD), emb_tm.dtype)], axis=0)
    win = jnp.concatenate([emb_ext[k:k + t_max] for k in range(kmax)],
                          axis=-1)                                 # (t_max,b_pad,ke)
    # Block the batch BEFORE the time-major flatten so each grid block gets a
    # contiguous, sublane-aligned (t_max*bb, ke) slab.
    win = win.reshape(t_max, nb, bb, ke).transpose(1, 0, 2, 3)
    win = win.reshape(nb, t_max * bb, ke)

    # -1e30 mask for the tail window positions invalid for larger filter sizes
    # (static, folded into the compiled program as a constant).
    mask_np = np.zeros((n_tail, 1, nf_tot), np.float32)
    for i, fs in enumerate(FILTER_SIZES):
        t_i = S - fs + 1
        for j in range(n_tail):
            if t_max - n_tail + j >= t_i:
                mask_np[j, 0, i * NF:(i + 1) * NF] = -1e30
    mask = jnp.asarray(mask_np)

    out = pl.pallas_call(
        textcnn_kernel,
        out_shape=jax.ShapeDtypeStruct((nb, bb, C), jnp.float32),
        grid=(nb,),
        in_specs=[
            pl.BlockSpec((1, t_max * bb, ke), lambda i: (i, 0, 0)),   # windows
            pl.BlockSpec((ke, nf_tot), lambda i: (0, 0)),             # wconv
            pl.BlockSpec((1, nf_tot), lambda i: (0, 0)),              # bconv
            pl.BlockSpec((n_tail, 1, nf_tot), lambda i: (0, 0, 0)),   # mask
            pl.BlockSpec((nf_tot, C), lambda i: (0, 0)),              # wfc
            pl.BlockSpec((1, C), lambda i: (0, 0)),                   # bfc
        ],
        out_specs=pl.BlockSpec((1, bb, C), lambda i: (i, 0, 0)),
        compiler_params=pltpu.CompilerParams(
            dimension_semantics=("parallel",)),  # v7x: 2 TCs split batch blocks
    )(win, packed["wconv"], packed["bconv"], mask, packed["wfc"], packed["bfc"])

    return out.reshape(b_pad, C)[:B]


def textcnn_reference(tokens, params):
    """Pure-JAX replica of the PyTorch TextCNN forward for verification."""
    emb = params["embedding"][tokens]                       # (B, S, E)
    S = tokens.shape[1]
    pooled_outputs = []
    for i, fs in enumerate(FILTER_SIZES):
        w = params[f"conv_w_{i}"][:, 0]                     # (NF, fs, E)
        b = params[f"conv_b_{i}"]                           # (NF,)
        T = S - fs + 1
        windows = jnp.stack([emb[:, t:t + fs, :] for t in range(T)], axis=1)
        conv = jnp.einsum("btke,fke->btf", windows, w) + b  # (B, T, NF)
        h = jnp.maximum(conv, 0.0)
        pooled_outputs.append(jnp.max(h, axis=1))           # (B, NF)
    h_pool_flat = jnp.concatenate(pooled_outputs, axis=1)   # (B, n_fs*NF)
    return h_pool_flat @ params["fc_w"].T + params["fc_b"]


if __name__ == "__main__":
    key = jax.random.PRNGKey(0)
    k_tok, k_par = jax.random.split(key)
    tokens = jax.random.randint(k_tok, (BATCH, SEQ_LEN), 0, VOCAB_SIZE,
                                dtype=jnp.int32)
    params = init_params(k_par)
    packed = pack_params(params)

    out = textcnn_forward(tokens, packed)
    out = jax.block_until_ready(out)

    ref = textcnn_reference(tokens, params)
    assert out.shape == (BATCH, NUM_CLASS), out.shape
    max_err = jnp.max(jnp.abs(out - ref))
    assert jnp.allclose(out, ref, atol=2e-2, rtol=2e-2), (
        f"max abs err {max_err}")
    print("KERNEL_OK")
</pallas_src>

<mosaic_0001>
module attributes {stable_mosaic.version = 11 : i64} {
  func.func @textcnn_kernel(%arg0: i32, %arg1: memref<1x120x32xbf16, #tpu.memory_space<vmem>>, %arg2: memref<32x150xbf16, #tpu.memory_space<vmem>>, %arg3: memref<1x150xf32, #tpu.memory_space<vmem>>, %arg4: memref<2x1x150xf32, #tpu.memory_space<vmem>>, %arg5: memref<150x5xbf16, #tpu.memory_space<vmem>>, %arg6: memref<1x5xf32, #tpu.memory_space<vmem>>, %arg7: memref<1x8x5xf32, #tpu.memory_space<vmem>>) attributes {dimension_semantics = [#tpu.dimension_semantics<parallel>], iteration_bounds = array<i64: 2>, scalar_prefetch = 0 : i64, scratch_operands = 0 : i64, tpu.core_type = #tpu.core_type<tc>, window_params = [{transform_indices = @transform_0, window_bounds = array<i64: 1, 120, 32>}, {pipeline_mode = #tpu.pipeline_mode<synchronous>, transform_indices = @transform_1, window_bounds = array<i64: 32, 150>}, {pipeline_mode = #tpu.pipeline_mode<synchronous>, transform_indices = @transform_2, window_bounds = array<i64: 1, 150>}, {pipeline_mode = #tpu.pipeline_mode<synchronous>, transform_indices = @transform_3, window_bounds = array<i64: 2, 1, 150>}, {pipeline_mode = #tpu.pipeline_mode<synchronous>, transform_indices = @transform_4, window_bounds = array<i64: 150, 5>}, {pipeline_mode = #tpu.pipeline_mode<synchronous>, transform_indices = @transform_5, window_bounds = array<i64: 1, 5>}, {transform_indices = @transform_6, window_bounds = array<i64: 1, 8, 5>}]} {
    %c0 = arith.constant 0 : index
    %c0_0 = arith.constant 0 : index
    %c0_1 = arith.constant 0 : index
    %0 = vector.load %arg1[%c0, %c0_0, %c0_1] : memref<1x120x32xbf16, #tpu.memory_space<vmem>>, vector<1x120x32xbf16>
    %1 = vector.shape_cast %0 : vector<1x120x32xbf16> to vector<120x32xbf16>
    %c0_2 = arith.constant 0 : index
    %c0_3 = arith.constant 0 : index
    %2 = vector.load %arg2[%c0_2, %c0_3] : memref<32x150xbf16, #tpu.memory_space<vmem>>, vector<32x150xbf16>
    %cst = arith.constant dense<0.000000e+00> : vector<120x150xf32>
    %3 = tpu.matmul %1, %2, %cst {dimension_numbers = #tpu.dot_dimension_numbers<[1], [0], [0], [1], [0, 0, 1, 1], [], []>} : vector<120x32xbf16>, vector<32x150xbf16>, vector<120x150xf32> -> vector<120x150xf32>
    %4 = vector.extract_strided_slice %3 {offsets = [0, 0], sizes = [8, 150], strides = [1, 1]} : vector<120x150xf32> to vector<8x150xf32>
    %5 = vector.extract_strided_slice %3 {offsets = [8, 0], sizes = [8, 150], strides = [1, 1]} : vector<120x150xf32> to vector<8x150xf32>
    %6 = vector.extract_strided_slice %3 {offsets = [16, 0], sizes = [8, 150], strides = [1, 1]} : vector<120x150xf32> to vector<8x150xf32>
    %7 = arith.maximumf %5, %6 : vector<8x150xf32>
    %8 = arith.maximumf %4, %7 : vector<8x150xf32>
    %9 = vector.extract_strided_slice %3 {offsets = [24, 0], sizes = [8, 150], strides = [1, 1]} : vector<120x150xf32> to vector<8x150xf32>
    %10 = vector.extract_strided_slice %3 {offsets = [32, 0], sizes = [8, 150], strides = [1, 1]} : vector<120x150xf32> to vector<8x150xf32>
    %11 = arith.maximumf %9, %10 : vector<8x150xf32>
    %12 = vector.extract_strided_slice %3 {offsets = [40, 0], sizes = [8, 150], strides = [1, 1]} : vector<120x150xf32> to vector<8x150xf32>
    %13 = vector.extract_strided_slice %3 {offsets = [48, 0], sizes = [8, 150], strides = [1, 1]} : vector<120x150xf32> to vector<8x150xf32>
    %14 = arith.maximumf %12, %13 : vector<8x150xf32>
    %15 = arith.maximumf %11, %14 : vector<8x150xf32>
    %16 = arith.maximumf %8, %15 : vector<8x150xf32>
    %17 = vector.extract_strided_slice %3 {offsets = [56, 0], sizes = [8, 150], strides = [1, 1]} : vector<120x150xf32> to vector<8x150xf32>
    %18 = vector.extract_strided_slice %3 {offsets = [64, 0], sizes = [8, 150], strides = [1, 1]} : vector<120x150xf32> to vector<8x150xf32>
    %19 = arith.maximumf %17, %18 : vector<8x150xf32>
    %20 = vector.extract_strided_slice %3 {offsets = [72, 0], sizes = [8, 150], strides = [1, 1]} : vector<120x150xf32> to vector<8x150xf32>
    %21 = vector.extract_strided_slice %3 {offsets = [80, 0], sizes = [8, 150], strides = [1, 1]} : vector<120x150xf32> to vector<8x150xf32>
    %22 = arith.maximumf %20, %21 : vector<8x150xf32>
    %23 = arith.maximumf %19, %22 : vector<8x150xf32>
    %24 = vector.extract_strided_slice %3 {offsets = [88, 0], sizes = [8, 150], strides = [1, 1]} : vector<120x150xf32> to vector<8x150xf32>
    %25 = vector.extract_strided_slice %3 {offsets = [96, 0], sizes = [8, 150], strides = [1, 1]} : vector<120x150xf32> to vector<8x150xf32>
    %26 = arith.maximumf %24, %25 : vector<8x150xf32>
    %27 = vector.extract_strided_slice %3 {offsets = [104, 0], sizes = [8, 150], strides = [1, 1]} : vector<120x150xf32> to vector<8x150xf32>
    %c0_4 = arith.constant 0 : index
    %c0_5 = arith.constant 0 : index
    %c0_6 = arith.constant 0 : index
    %28 = vector.load %arg4[%c0_4, %c0_5, %c0_6] : memref<2x1x150xf32, #tpu.memory_space<vmem>>, vector<1x1x150xf32>
    %29 = vector.shape_cast %28 : vector<1x1x150xf32> to vector<1x150xf32>
    %30 = vector.broadcast %29 : vector<1x150xf32> to vector<8x150xf32>
    %31 = arith.addf %27, %30 : vector<8x150xf32>
    %32 = vector.extract_strided_slice %3 {offsets = [112, 0], sizes = [8, 150], strides = [1, 1]} : vector<120x150xf32> to vector<8x150xf32>
    %c1 = arith.constant 1 : index
    %c0_7 = arith.constant 0 : index
    %c0_8 = arith.constant 0 : index
    %33 = vector.load %arg4[%c1, %c0_7, %c0_8] : memref<2x1x150xf32, #tpu.memory_space<vmem>>, vector<1x1x150xf32>
    %34 = vector.shape_cast %33 : vector<1x1x150xf32> to vector<1x150xf32>
    %35 = vector.broadcast %34 : vector<1x150xf32> to vector<8x150xf32>
    %36 = arith.addf %32, %35 : vector<8x150xf32>
    %37 = arith.maximumf %31, %36 : vector<8x150xf32>
    %38 = arith.maximumf %26, %37 : vector<8x150xf32>
    %39 = arith.maximumf %23, %38 : vector<8x150xf32>
    %40 = arith.maximumf %16, %39 : vector<8x150xf32>
    %c0_9 = arith.constant 0 : index
    %c0_10 = arith.constant 0 : index
    %41 = vector.load %arg3[%c0_9, %c0_10] : memref<1x150xf32, #tpu.memory_space<vmem>>, vector<1x150xf32>
    %42 = vector.broadcast %41 : vector<1x150xf32> to vector<8x150xf32>
    %43 = arith.addf %40, %42 : vector<8x150xf32>
    %cst_11 = arith.constant 0.000000e+00 : f32
    %44 = vector.broadcast %cst_11 : f32 to vector<8x150xf32>
    %45 = arith.maximumf %43, %44 : vector<8x150xf32>
    %46 = arith.truncf %45 : vector<8x150xf32> to vector<8x150xbf16>
    %c0_12 = arith.constant 0 : index
    %c0_13 = arith.constant 0 : index
    %47 = vector.load %arg5[%c0_12, %c0_13] : memref<150x5xbf16, #tpu.memory_space<vmem>>, vector<150x5xbf16>
    %cst_14 = arith.constant dense<0.000000e+00> : vector<8x5xf32>
    %48 = tpu.matmul %46, %47, %cst_14 {dimension_numbers = #tpu.dot_dimension_numbers<[1], [0], [0], [1], [0, 0, 1, 1], [], []>} : vector<8x150xbf16>, vector<150x5xbf16>, vector<8x5xf32> -> vector<8x5xf32>
    %c0_15 = arith.constant 0 : index
    %c0_16 = arith.constant 0 : index
    %49 = vector.load %arg6[%c0_15, %c0_16] : memref<1x5xf32, #tpu.memory_space<vmem>>, vector<1x5xf32>
    %50 = vector.broadcast %49 : vector<1x5xf32> to vector<8x5xf32>
    %51 = arith.addf %48, %50 : vector<8x5xf32>
    %c0_17 = arith.constant 0 : index
    %c0_18 = arith.constant 0 : index
    %c0_19 = arith.constant 0 : index
    %52 = vector.load %arg7[%c0_17, %c0_18, %c0_19] : memref<1x8x5xf32, #tpu.memory_space<vmem>>, vector<1x8x5xf32>
    %53 = vector.shape_cast %52 : vector<1x8x5xf32> to vector<8x5xf32>
    %54 = vector.shape_cast %51 : vector<8x5xf32> to vector<1x8x5xf32>
    tpu.vector_store %arg7[%c0_17, %c0_18, %c0_19], %54 {strides = array<i32>} : memref<1x8x5xf32, #tpu.memory_space<vmem>>, vector<1x8x5xf32>,
    return
  }
  func.func @transform_0(%arg0: i32) -> (i32, i32, i32) {
    %c0_i32 = arith.constant 0 : i32
    %c0_i32_0 = arith.constant 0 : i32
    %c0_i32_1 = arith.constant 0 : i32
    return %arg0, %c0_i32, %c0_i32_0 : i32, i32, i32
  }
  func.func @transform_1(%arg0: i32) -> (i32, i32) {
    %c0_i32 = arith.constant 0 : i32
    %c0_i32_0 = arith.constant 0 : i32
    %c0_i32_1 = arith.constant 0 : i32
    return %c0_i32, %c0_i32_0 : i32, i32
  }
  func.func @transform_2(%arg0: i32) -> (i32, i32) {
    %c0_i32 = arith.constant 0 : i32
    %c0_i32_0 = arith.constant 0 : i32
    %c0_i32_1 = arith.constant 0 : i32
    return %c0_i32, %c0_i32_0 : i32, i32
  }
  func.func @transform_3(%arg0: i32) -> (i32, i32, i32) {
    %c0_i32 = arith.constant 0 : i32
    %c0_i32_0 = arith.constant 0 : i32
    %c0_i32_1 = arith.constant 0 : i32
    %c0_i32_2 = arith.constant 0 : i32
    return %c0_i32, %c0_i32_0, %c0_i32_1 : i32, i32, i32
  }
  func.func @transform_4(%arg0: i32) -> (i32, i32) {
    %c0_i32 = arith.constant 0 : i32
    %c0_i32_0 = arith.constant 0 : i32
    %c0_i32_1 = arith.constant 0 : i32
    return %c0_i32, %c0_i32_0 : i32, i32
  }
  func.func @transform_5(%arg0: i32) -> (i32, i32) {
    %c0_i32 = arith.constant 0 : i32
    %c0_i32_0 = arith.constant 0 : i32
    %c0_i32_1 = arith.constant 0 : i32
    return %c0_i32, %c0_i32_0 : i32, i32
  }
  func.func @transform_6(%arg0: i32) -> (i32, i32, i32) {
    %c0_i32 = arith.constant 0 : i32
    %c0_i32_0 = arith.constant 0 : i32
    %c0_i32_1 = arith.constant 0 : i32
    return %arg0, %c0_i32, %c0_i32_0 : i32, i32, i32
  }
}

</mosaic_0001>

<bundles_post_ra>
// kernel: textcnn_forward.1
= control target key start
LH: loop header
LB: loop body
LE: loop exit
PB: predicated region body
PF: predicated region fallthrough
CT: control target
= control target key end

     0   :  { %s859_s21 = smov 0   ;;  %s980_s0 = inlined_call_operand.vmem [shape: bf16[2,120,32], index: 0, kind: input, shape index: {}]   ;;  %s981_s1 = inlined_call_operand.vmem [shape: bf16[32,150], index: 1, kind: input, shape index: {}]   ;;  %s982_s2 = inlined_call_operand.vmem [shape: f32[1,150], index: 2, kind: input, shape index: {}]   ;;  %s983_s3 = inlined_call_operand.vmem [shape: f32[2,1,150], index: 3, kind: input, shape index: {}]   ;;  %s984_s4 = inlined_call_operand.vmem [shape: bf16[150,5], index: 4, kind: input, shape index: {}]   ;;  %s985_s5 = inlined_call_operand.vmem [shape: f32[1,5], index: 5, kind: input, shape index: {}]   ;;  %s986_s6 = inlined_call_operand.vmem [shape: f32[2,8,5], index: 6, kind: output, shape index: {}]  }
   0x1 LB: > { %s675_s22 = sadd.s32 4294967295, %s822_s21   ;;  %p679_p0 = scmp.ge.s32.totalorder %s822_s21, 1  ;;  %s822_s21 = sphi %s859_s21, %s16_s21  }
   0x2   : > { %p212_p1 = scmp.lt.s32.totalorder %s822_s21, 3 }
   0x4   : > { %p213_p2 = pnand %p679_p0, %p212_p1 }
   0x5   : > { %p241_p3 = scmp.lt.s32.totalorder (!%p213_p2), %s675_s22, 1 }
   0x6   : > { %216 = sbr.rel (%p213_p2) target bundleno = 374 (0x176), region = 44 }
   0xb   : > { %v720_v0 = vld [vmem:[%s981_s1 + $0x10] sm:$0xf]  ;;  %v792_v1 = vld [vmem:[%s981_s1 + $0x14] sm:$0xf0]  ;;  %v791_v2 = vld [vmem:[%s981_s1 + $0x14] sm:$0xf] }
   0xc   : > { %v721_v3 = vor.u32 %v792_v1, %v720_v0  ;;  %v722_v4 = vld [vmem:[%s981_s1 + $0x18] sm:$0xf0]  ;;  %v712_v5 = vld [vmem:[%s981_s1] sm:$0xf]  ;;  %v790_v6 = vld [vmem:[%s981_s1 + $0x4] sm:$0xf0] }
   0xd   : > { %v725_v7 = vor.u32 %v791_v2, %v722_v4  ;;  %v789_v8 = vld [vmem:[%s981_s1 + $0x4] sm:$0xf]  ;;  %v714_v9 = vld [vmem:[%s981_s1 + $0x8] sm:$0xf0]  ;;  %v713_v10 = vor.u32 %v790_v6, %v712_v5  ;;  %s988_s22 = smov (!%p241_p3, %s675_s22), 1  ;;  %vm328_vm0 = vcmask 261120  }
   0xe   : > { %359 = vmatpush.bf16.msra.mxu0 %v721_v3  ;;  %802 = vmatpush.bf16.msra.mxu3 %v721_v3  ;;  %v717_v11 = vor.u32 %v789_v8, %v714_v9  ;;  %s806_s15 = smul.u32 60, %s988_s22  ;;  %v800_v28 = vld [vmem:[%s984_s4 + $0x38] sm:$0xff]  ;;  %v524_v29 = vld [vmem:[%s984_s4 + $0x48] sm:$0x7]  ;;  %vm590_vm1 = vcmask 1042432   ;;  %v799_v32 = vld [vmem:[%s984_s4 + $0x30] sm:$0xff] }
   0xf   : > { %407 = vmatpush.bf16.msra.mxu1 %v725_v7  ;;  %804 = vmatpush.bf16.msra.mxu2 %v725_v7  ;;  %v566_v30 = vunpack.c.l.b16 %v524_v29  ;;  %v798_v43 = vld [vmem:[%s984_s4 + $0x28] sm:$0xff]  ;;  %v797_v47 = vld [vmem:[%s984_s4 + $0x20] sm:$0xff]  ;;  %v796_v49 = vld [vmem:[%s984_s4 + $0x18] sm:$0xff]  ;;  %vm586_vm2 = vcmask 179200   ;;  %s681_s27 = sshll.u32 %s988_s22, 3  ;;  %vm620_vm3 = vcmask 39936  }
  0x10   : > { %s245_s18 = scalar_lea.vmem %s980_s0, %s806_s15  ;;  %v801_v48 = vld [vmem:[%s984_s4 + $0x40] sm:$0xff]  ;;  %v795_v54 = vld [vmem:[%s984_s4 + $0x10] sm:$0xff]  ;;  %v794_v61 = vld [vmem:[%s984_s4 + $0x8] sm:$0xff]  ;;  %s249_s30 = scalar_lea.vmem %s986_s6, %s681_s27 }
  0x11   : > { %v782_v12 = vld [vmem:[%s245_s18] sm:$0xff]  ;;  %v787_v13 = vld [vmem:[%s245_s18 + $0x28] sm:$0xff]  ;;  %v788_v15 = vld [vmem:[%s245_s18 + $0x30] sm:$0xff]  ;;  %v576_v34 = vpack.c.b16 %v566_v30, %v566_v30 }
  0x12   : > { %360 = vmatpush.bf16.msra.mxu0 %v713_v10  ;;  %803 = vmatpush.bf16.msra.mxu3 %v713_v10  ;;  %v783_v14 = vld [vmem:[%s245_s18 + $0x8] sm:$0xff]  ;;  %v265_v16 = vld [vmem:[%s245_s18 + $0x38] sm:$0xf]  ;;  %v784_v18 = vld [vmem:[%s245_s18 + $0x10] sm:$0xff] }
  0x13   : > { %408 = vmatpush.bf16.msra.mxu1 %v717_v11  ;;  %805 = vmatpush.bf16.msra.mxu2 %v717_v11  ;;  %v299_v17 = vunpack.c.l.b16 %v265_v16  ;;  %v785_v20 = vld [vmem:[%s245_s18 + $0x18] sm:$0xff]  ;;  %v786_v21 = vld [vmem:[%s245_s18 + $0x20] sm:$0xff]  ;;  %v592_v38 = vsel %vm590_vm1, %v576_v34, 0 }
  0x14   : > { %v793_v0 = vld [vmem:[%s984_s4] sm:$0xff] }
  0x15   : > { %726 = vmatmul.msk.bf16.vlgmr.msra.gmra.mxu0 %vm328_vm0, %v782_v12  ;;  %731 = vmatmul.msk.bf16.vlgmr.msra.gmra.mxu3 %vm328_vm0, %v787_v13  ;;  %v307_v19 = vpack.c.b16 %v299_v17, %v299_v17  ;;  %v469_v3 = vld [vmem:[%s983_s3] sm:$0x3]  ;;  %v742_v4 = vld [vmem:[%s983_s3 + $0x2] sm:$0x3] }
  0x16   : > { %734 = vmatmul.msk.bf16.vlgmr.msra.gmra.mxu1 %vm328_vm0, %v782_v12  ;;  %739 = vmatmul.msk.bf16.vlgmr.msra.gmra.mxu2 %vm328_vm0, %v787_v13  ;;  %v471_v5 = vperm.slane %v469_v3, 0  ;;  %v480_v6 = vperm.slane %v742_v4, 0  ;;  %v472_v7 = vperm.slane %v469_v3, 1  ;;  %v481_v8 = vperm.slane %v742_v4, 1 }
  0x17   : > { %594 = vmatpush.bf16.msrb.mxu2 %v800_v28  ;;  %613 = vmatpush.bf16.msrb.mxu3 %v592_v38 }
  0x1b   : > { %595 = vmatpush.bf16.msrb.mxu2 %v799_v32  ;;  %614 = vmatpush.bf16.msrb.mxu3 %v801_v48 }
  0x1f   : > { %596 = vmatpush.bf16.msrb.mxu2 %v798_v43 }
  0x23   : > { %597 = vmatpush.bf16.msrb.mxu2 %v797_v47 }
  0x25   : > { %727 = vmatmul.msk.bf16.gmra.mxu0 %vm328_vm0, %v783_v14  ;;  %732 = vmatmul.msk.bf16.gmra.mxu3 %vm328_vm0, %v788_v15 }
  0x26   : > { %735 = vmatmul.msk.bf16.gmra.mxu1 %vm328_vm0, %v783_v14  ;;  %740 = vmatmul.msk.bf16.gmra.mxu2 %vm328_vm0, %v788_v15 }
  0x27   : > { %598 = vmatpush.bf16.msrb.mxu2 %v796_v49 }
  0x2b   : > { %599 = vmatpush.bf16.msrb.mxu2 %v795_v54 }
  0x2f   : > { %600 = vmatpush.bf16.msrb.mxu2 %v794_v61 }
  0x33   : > { %601 = vmatpush.bf16.msrb.mxu2 %v793_v0 }
  0x35   : > { %728 = vmatmul.msk.bf16.gmra.mxu0 %vm328_vm0, %v784_v18  ;;  %733 = vmatmul.msk.bf16.gmra.mxu3 %vm328_vm0, %v307_v19 }
  0x36   : > { %736 = vmatmul.msk.bf16.gmra.mxu1 %vm328_vm0, %v784_v18  ;;  %741 = vmatmul.msk.bf16.gmra.mxu2 %vm328_vm0, %v307_v19 }
  0x45   : > { %729 = vmatmul.msk.bf16.gmra.mxu0 %vm328_vm0, %v785_v20 }
  0x46   : > { %737 = vmatmul.msk.bf16.gmra.mxu1 %vm328_vm0, %v785_v20 }
  0x55   : > { %730 = vmatmul.msk.bf16.gmra.mxu0 %vm328_vm0, %v786_v21 }
  0x56   : > { %738 = vmatmul.msk.bf16.gmra.mxu1 %vm328_vm0, %v786_v21 }
  0x92   : > { %v362_v22 = vpop.f32.mrf.mxu0 }
  0x93   : > { %v410_v23 = vpop.f32.mrf.mxu1 }
  0x98   : > { %v913_v24 = vpop.f32.mrf.mxu3 }
  0x99   : > { %v915_v25 = vpop.f32.mrf.mxu2 }
  0x9a   : > { %v364_v26 = vpop.f32.mrf.mxu0 }
  0x9b   : > { %v412_v27 = vpop.f32.mrf.mxu1 }
  0xa0   : > { %v923_v31 = vpop.f32.mrf.mxu3 }
  0xa1   : > { %v928_v33 = vpop.f32.mrf.mxu2 }
  0xa2   : > { %v367_v35 = vpop.f32.mrf.mxu0 }
  0xa3   : > { %v449_v36 = vmax.f32 %v364_v26, %v367_v35  ;;  %v415_v37 = vpop.f32.mrf.mxu1  ;;  %v494_v35 = vld [vmem:[%s982_s2] sm:$0x3] }
  0xa4   : > { %v450_v39 = vmax.f32 %v412_v27, %v415_v37  ;;  %v496_v43 = vperm.slane %v494_v35, 0 }
  0xa5   : > { %v930_v40 = vmax.f32 %v362_v22, %v449_v36 }
  0xa6   : > { %v932_v41 = vmax.f32 %v410_v23, %v450_v39 }
  0xa8   : > { %v392_v42 = vpop.f32.mrf.mxu3 }
  0xa9   : > { %v440_v44 = vpop.f32.mrf.mxu2  ;;  %v467_v22 = vmax.f32 %v923_v31, %v392_v42 }
  0xaa   : > { %v369_v45 = vpop.f32.mrf.mxu0  ;;  %v468_v29 = vmax.f32 %v928_v33, %v440_v44  ;;  %v497_v44 = vperm.slane %v494_v35, 1 }
  0xab   : > { %v417_v46 = vpop.f32.mrf.mxu1 }
  0xb0   : > { %v394_v50 = vpop.f32.mrf.mxu3 }
  0xb1   : > { %v442_v51 = vpop.f32.mrf.mxu2  ;;  %v475_v11 = vadd.f32 %v471_v5, %v394_v50 }
  0xb2   : > { %v372_v52 = vpop.f32.mrf.mxu0  ;;  %v476_v13 = vadd.f32 %v472_v7, %v442_v51 }
  0xb3   : > { %v420_v53 = vpop.f32.mrf.mxu1  ;;  %v453_v17 = vmax.f32 %v369_v45, %v372_v52 }
  0xb4   : > { %v454_v19 = vmax.f32 %v417_v46, %v420_v53 }
  0xb8   : > { %v397_v55 = vpop.f32.mrf.mxu3 }
  0xb9   : > { %v445_v56 = vpop.f32.mrf.mxu2  ;;  %v484_v12 = vadd.f32 %v480_v6, %v397_v55 }
  0xba   : > { %v374_v57 = vpop.f32.mrf.mxu0  ;;  %v485_v14 = vadd.f32 %v481_v8, %v445_v56 }
  0xbb   : > { %v422_v58 = vpop.f32.mrf.mxu1  ;;  %v486_v18 = vmax.f32 %v475_v11, %v484_v12 }
  0xbc   : > { %v487_v20 = vmax.f32 %v476_v13, %v485_v14 }
  0xbd   : > { %v488_v36 = vmax.f32 %v467_v22, %v486_v18 }
  0xbe   : > { %v489_v38 = vmax.f32 %v468_v29, %v487_v20 }
  0xc0   : > { %v399_v59 = vpop.f32.mrf.mxu3 }
  0xc1   : > { %v447_v60 = vpop.f32.mrf.mxu2 }
  0xc2   : > { %v377_v62 = vpop.f32.mrf.mxu0 }
  0xc3   : > { %v425_v63 = vpop.f32.mrf.mxu1  ;;  %v455_v15 = vmax.f32 %v374_v57, %v377_v62 }
  0xc4   : > { %v456_v16 = vmax.f32 %v422_v58, %v425_v63 }
  0xc5   : > { %v457_v23 = vmax.f32 %v453_v17, %v455_v15 }
  0xc6   : > { %v458_v30 = vmax.f32 %v454_v19, %v456_v16 }
  0xc7   : > { %v459_v31 = vmax.f32 %v930_v40, %v457_v23  ;;  %v815_v40 = vld [vmem:[%s985_s5] ss:$0 sm:$0xff] }
  0xca   : > { %v379_v1 = vpop.f32.mrf.mxu0 }
  0xcb   : > { %v427_v2 = vpop.f32.mrf.mxu1 }
  0xd2   : > { %v382_v9 = vpop.f32.mrf.mxu0 }
  0xd3   : > { %v430_v10 = vpop.f32.mrf.mxu1  ;;  %v461_v26 = vmax.f32 %v379_v1, %v382_v9 }
  0xd4   : > { %v462_v32 = vmax.f32 %v427_v2, %v430_v10 }
  0xda   : > { %v384_v21 = vpop.f32.mrf.mxu0 }
  0xdb   : > { %v463_v27 = vmax.f32 %v384_v21, %v913_v24  ;;  %v432_v28 = vpop.f32.mrf.mxu1  ;;  %v460_v24 = vmax.f32 %v932_v41, %v458_v30 }
  0xdc   : > { %v464_v34 = vmax.f32 %v432_v28, %v915_v25 }
  0xdd   : > { %v465_v37 = vmax.f32 %v461_v26, %v463_v27 }
  0xde   : > { %v466_v39 = vmax.f32 %v462_v32, %v464_v34 }
  0xdf   : > { %v490_v42 = vmax.f32 %v465_v37, %v488_v36 }
  0xe0   : > { %v491_v33 = vmax.f32 %v466_v39, %v489_v38 }
  0xe1   : > { %v492_v45 = vmax.f32 %v459_v31, %v490_v42 }
  0xe2   : > { %v493_v46 = vmax.f32 %v460_v24, %v491_v33 }
  0xe3   : > { %v500_v25 = vadd.f32 %v496_v43, %v492_v45 }
  0xe4   : > { %v501_v47 = vadd.f32 %v497_v44, %v493_v46 }
  0xe5   : > { %v502_v48 = vmax.f32 %v500_v25, 0.0 }
  0xe6   : > { %v503_v49 = vmax.f32 %v501_v47, 0.0 }
  0xe7   : > { %v504_v50 = vpack.c.bf16 %v502_v48, %v502_v48 }
  0xe8   : > { %v505_v51 = vpack.c.bf16 %v503_v49, %v503_v49 }
  0xe9   : > { %602 = vmatmul.bf16.vlgmr.msrb.gmra.mxu2 %v504_v50 }
  0xea   : > { %779 = vmatmul.msk.bf16.vlgmr.msrb.gmra.mxu3 %vm586_vm2, %v505_v51 }
 0x16c   : > { %v603_v52 = vpop.f32.mrf.mxu2 }
 0x16d   : > { %v604_v41 = vadd.f32 %v815_v40, %v603_v52  ;;  %v616_v53 = vpop.f32.mrf.mxu3 }
 0x16f   : > { %v617_v54 = vadd.f32 %v616_v53, %v604_v41 }
 0x171   : > { %621 = vst.msk [vmem:[%s249_s30] sm:$0xff] %vm620_vm3, %v617_v54 }
 0x174   : > { %v605_v55 = vpop.f32.mrf.mxu2 }
 0x175   : > { %v618_v56 = vpop.f32.mrf.mxu3 }
 0x176 PF: > { %s16_s21 = sadd.s32 1, %s822_s21  }
 0x177   : > { %p13_p4 = scmp.ge.s32.totalorder %s16_s21, 4  }
 0x179   :  { %15 = sbr.rel (!%p13_p4) target bundleno = 1 (0x1), region = 75 }

</bundles_post_ra>
